<compile_context>
chip_gen: v7x
topology: tpu7x:2x2x1
jax: 0.10.0
libtpu: 0.0.40
codegen_flags: <defaults>
</compile_context>

<pallas_src>
import functools

import jax
import jax.numpy as jnp
from jax.experimental import pallas as pl
from jax.experimental.pallas import tpu as pltpu


def _round_up(x, m):
    return ((x + m - 1) // m) * m


def _cdiv(a, b):
    return (a + b - 1) // b


@functools.lru_cache(maxsize=None)
def _vmem_capacity_bytes():
    try:
        return int(pltpu.get_tpu_info().vmem_capacity_bytes)
    except Exception:
        return 64 << 20  # v7x per-TensorCore VMEM; conservative on v5e/v6e.


def _ls_nll_kernel(tgt_ref, logp_ref, smooth_ref, nll_ref, *,
                   ignore_index, class_tile, n_classes, needs_col_mask):
    """One (row_tile, class_tile) block of log_preds.

    Grid axis 1 (class tiles) is the reduction axis: the per-row output blocks
    are revisited across it and act as accumulators (init at class step 0,
    masked/negated at the last class step, then written back to HBM).
    """
    ci = pl.program_id(1)
    last_c = pl.num_programs(1) - 1

    logp = logp_ref[...]                                  # (row_tile, class_tile)
    rows, cols = logp.shape

    # Lane ids within this class tile (a compile-time constant iota); the tile
    # offset is applied to the narrow (rows, 1) target instead (one vreg op).
    lane = jax.lax.broadcasted_iota(jnp.int32, (rows, cols), 1)
    rel_t = tgt_ref[...] - ci * class_tile                # (row_tile, 1) int32

    if needs_col_mask:
        # Ragged class tail: the last class tile reads past C; zero those
        # columns out of the smoothing sum (the one-hot pick can never land
        # there because valid targets are always < n_classes).
        rem = n_classes - ci * class_tile
        logp_for_sum = jnp.where(lane < rem, logp, jnp.zeros_like(logp))
    else:
        logp_for_sum = logp

    row_sum = jnp.sum(logp_for_sum, axis=-1, keepdims=True, dtype=jnp.float32)
    picked = jnp.sum(jnp.where(lane == rel_t, logp, jnp.zeros_like(logp)),
                     axis=-1, keepdims=True, dtype=jnp.float32)

    @pl.when(ci == 0)
    def _init():
        smooth_ref[...] = jnp.zeros_like(smooth_ref)
        nll_ref[...] = jnp.zeros_like(nll_ref)

    smooth_ref[...] += row_sum
    nll_ref[...] += picked

    @pl.when(ci == last_c)
    def _finalize():
        neg_valid = -(tgt_ref[...] != ignore_index).astype(jnp.float32)
        smooth_ref[...] *= neg_valid     # -> -sum_c logp, zeroed at ignored rows
        nll_ref[...] *= neg_valid        # -> -logp[target], zeroed at ignored rows


def label_smoothing_nll_loss(log_preds, target, *, epsilon=0.1,
                             ignore_index=-100, reduction="mean",
                             row_tile=512, class_tile=None):
    """log_preds: (N, C) float log-probabilities; target: (N,) int labels."""
    n_rows, n_classes = log_preds.shape
    itemsize = jnp.dtype(log_preds.dtype).itemsize
    sublane = {4: 8, 2: 16, 1: 32}.get(itemsize, 8)

    # Per-input-buffer budget: double-buffered log_preds ~40% of VMEM, capped at
    # 16 MiB/buffer (plenty to amortise the ~0.35 us per-grid-step overhead).
    block_budget = min(_vmem_capacity_bytes() // 5, 16 << 20)

    # --- Row tiling (the "parallel" / megacore axis) ---
    row_tile = max(int(row_tile), sublane)
    row_tile = min(row_tile, _round_up(n_rows, sublane))
    if _cdiv(n_rows, row_tile) == 1 and n_rows > sublane:
        # v7x has 2 TensorCores: make sure the parallel axis has >= 2 tiles.
        row_tile = _round_up(_cdiv(n_rows, 2), sublane)
    if row_tile > n_rows:
        row_tile = n_rows            # single full-dim block (any size allowed)
    n_row_tiles = _cdiv(n_rows, row_tile)
    padded_rows = n_row_tiles * row_tile

    # --- Class tiling (the streamed / "arbitrary" reduction axis) ---
    if class_tile is None:
        class_tile = max(128, (block_budget // (row_tile * itemsize)) // 128 * 128)
    class_tile = int(class_tile)
    needs_col_mask = False
    if class_tile < n_classes:
        class_tile = max(128, (class_tile // 128) * 128)
    if class_tile >= n_classes:
        class_tile = n_classes       # single full-width class tile, no masking
        needs_col_mask = False
    else:
        needs_col_mask = (n_classes % class_tile) != 0
    n_class_tiles = _cdiv(n_classes, class_tile)

    # Target: tiny 1-D pad only; padded rows carry ignore_index so the garbage
    # log_preds rows of a ragged last row tile are zeroed before writeback.
    tgt = target.astype(jnp.int32)
    if padded_rows != n_rows:
        tgt = jnp.pad(tgt, (0, padded_rows - n_rows), constant_values=ignore_index)
    tgt2d = tgt.reshape(padded_rows, 1)

    kernel = functools.partial(
        _ls_nll_kernel,
        ignore_index=int(ignore_index),
        class_tile=int(class_tile),
        n_classes=int(n_classes),
        needs_col_mask=bool(needs_col_mask),
    )

    block_bytes = row_tile * class_tile * itemsize
    vmem_limit = max(16 << 20,
                     min(_vmem_capacity_bytes() * 3 // 4,
                         2 * block_bytes + (8 << 20)))

    cost = pl.CostEstimate(
        flops=5 * n_rows * n_classes,
        transcendentals=0,
        bytes_accessed=n_rows * n_classes * itemsize + padded_rows * 4
                       + 2 * padded_rows * 4,
    )

    row_out_spec = pl.BlockSpec((row_tile, 1), lambda r, c: (r, 0))

    smooth_pr, nll_pr = pl.pallas_call(
        kernel,
        out_shape=[
            jax.ShapeDtypeStruct((padded_rows, 1), jnp.float32),  # -sum_c logp (masked)
            jax.ShapeDtypeStruct((padded_rows, 1), jnp.float32),  # -logp[target] (masked)
        ],
        grid=(n_row_tiles, n_class_tiles),
        in_specs=[
            pl.BlockSpec((row_tile, 1), lambda r, c: (r, 0)),            # target
            pl.BlockSpec((row_tile, class_tile), lambda r, c: (r, c)),   # log_preds
        ],
        out_specs=[row_out_spec, row_out_spec],
        compiler_params=pltpu.CompilerParams(
            dimension_semantics=("parallel", "arbitrary"),
            vmem_limit_bytes=int(vmem_limit),
        ),
        cost_estimate=cost,
    )(tgt2d, log_preds)

    smooth = smooth_pr[:n_rows, 0]
    nll = nll_pr[:n_rows, 0]

    eps = jnp.float32(epsilon)
    inv_c = jnp.float32(1.0 / n_classes)

    if reduction == "mean":
        cnt = jnp.sum((target != ignore_index).astype(jnp.float32))
        loss_r = jnp.sum(smooth) / jnp.float32(n_rows)
        nll_r = jnp.sum(nll) / jnp.maximum(cnt, 1.0)   # guard: all-ignored batch
        return eps * (loss_r * inv_c) + (1.0 - eps) * nll_r
    elif reduction == "sum":
        return eps * (jnp.sum(smooth) * inv_c) + (1.0 - eps) * jnp.sum(nll)
    else:  # 'none' -> per-element losses, matching the unreduced torch path
        return eps * (smooth * inv_c) + (1.0 - eps) * nll


def _reference(log_preds, target, epsilon=0.1, ignore_index=-100, reduction="mean"):
    n_classes = log_preds.shape[-1]
    lp = jnp.asarray(log_preds, jnp.float32)
    valid = target != ignore_index
    smooth = jnp.where(valid, -jnp.sum(lp, axis=-1), 0.0)
    safe_t = jnp.where(valid, target, 0)
    picked = jnp.take_along_axis(lp, safe_t[:, None], axis=-1)[:, 0]
    nll_per = jnp.where(valid, -picked, 0.0)
    if reduction == "mean":
        loss = jnp.mean(smooth)
        nll = jnp.sum(nll_per) / jnp.sum(valid.astype(jnp.float32))
    elif reduction == "sum":
        loss = jnp.sum(smooth)
        nll = jnp.sum(nll_per)
    else:
        loss = smooth
        nll = nll_per
    return epsilon * (loss / n_classes) + (1 - epsilon) * nll


if __name__ == "__main__":
    key = jax.random.PRNGKey(0)
    k1, k2, k3, k4 = jax.random.split(key, 4)

    # Small case (single tile): N = batch*seq = 8 tokens, C = 32 classes.
    N, C = 8, 32
    log_preds = jax.nn.log_softmax(jax.random.normal(k1, (N, C), jnp.float32), -1)
    target = jax.random.randint(k2, (N,), 0, C, dtype=jnp.int32)
    target = target.at[1].set(-100).at[5].set(-100)

    for red in ("mean", "sum", "none"):
        out = jax.block_until_ready(
            label_smoothing_nll_loss(log_preds, target, epsilon=0.1,
                                     ignore_index=-100, reduction=red))
        ref = _reference(log_preds, target, reduction=red)
        assert jnp.allclose(out, ref, atol=1e-5, rtol=1e-5), (red, out, ref)

    # Multi-tile case with ragged rows AND a ragged class tail (no jnp.pad of
    # log_preds): N=300 rows, C=640 classes.
    N2, C2 = 300, 640
    lp2 = jax.nn.log_softmax(jax.random.normal(k3, (N2, C2), jnp.float32), -1)
    tgt2 = jax.random.randint(k4, (N2,), 0, C2, dtype=jnp.int32)
    tgt2 = tgt2.at[0].set(-100).at[17].set(-100).at[299].set(-100)

    # (a) explicit small tiles -> grid (3, 3): exercises the class-axis
    #     accumulator, the ragged-tail column mask and the ragged row tile.
    # (b) auto (generation-aware) tiles -> exercises the default sizing path
    #     including the >=2-row-tile split for v7x megacore.
    for cfg in ({"row_tile": 128, "class_tile": 256}, {}):
        for red in ("mean", "sum"):
            out2 = jax.block_until_ready(
                label_smoothing_nll_loss(lp2, tgt2, epsilon=0.1,
                                         ignore_index=-100, reduction=red, **cfg))
            ref2 = _reference(lp2, tgt2, reduction=red)
            assert jnp.allclose(out2, ref2, atol=1e-4, rtol=1e-5), (cfg, red, out2, ref2)

    print("KERNEL_OK")
</pallas_src>

<mosaic_0001>
module attributes {stable_mosaic.version = 11 : i64} {
  func.func @_ls_nll_kernel(%arg0: i32, %arg1: i32, %arg2: memref<8x1xi32, #tpu.memory_space<vmem>>, %arg3: memref<8x32xf32, #tpu.memory_space<vmem>>, %arg4: memref<8x1xf32, #tpu.memory_space<vmem>>, %arg5: memref<8x1xf32, #tpu.memory_space<vmem>>) attributes {dimension_semantics = [#tpu.dimension_semantics<parallel>, #tpu.dimension_semantics<arbitrary>], iteration_bounds = array<i64: 1, 1>, scalar_prefetch = 0 : i64, scratch_operands = 0 : i64, tpu.core_type = #tpu.core_type<tc>, window_params = [{transform_indices = @transform_0, window_bounds = array<i64: 8, 1>}, {transform_indices = @transform_1, window_bounds = array<i64: 8, 32>}, {transform_indices = @transform_2, window_bounds = array<i64: 8, 1>}, {transform_indices = @transform_3, window_bounds = array<i64: 8, 1>}]} {
    %c0 = arith.constant 0 : index
    %c0_0 = arith.constant 0 : index
    %0 = vector.load %arg3[%c0, %c0_0] : memref<8x32xf32, #tpu.memory_space<vmem>>, vector<8x32xf32>
    %1 = tpu.iota {dimensions = array<i32: 1>} : vector<8x32xi32>
    %c0_1 = arith.constant 0 : index
    %c0_2 = arith.constant 0 : index
    %2 = vector.load %arg2[%c0_1, %c0_2] : memref<8x1xi32, #tpu.memory_space<vmem>>, vector<8x1xi32>
    %c32_i32 = arith.constant 32 : i32
    %3 = arith.muli %arg1, %c32_i32 : i32
    %4 = vector.broadcast %3 : i32 to vector<8x1xi32>
    %5 = arith.subi %2, %4 : vector<8x1xi32>
    %cst = arith.constant dense<0.000000e+00> : vector<8xf32>
    %6 = vector.multi_reduction <add>, %0, %cst [1] : vector<8x32xf32> to vector<8xf32>
    %7 = vector.shape_cast %6 : vector<8xf32> to vector<8x1xf32>
    %8 = vector.broadcast %5 : vector<8x1xi32> to vector<8x32xi32>
    %9 = arith.cmpi eq, %1, %8 : vector<8x32xi32>
    %cst_3 = arith.constant 0.000000e+00 : f32
    %10 = vector.broadcast %cst_3 : f32 to vector<8x32xf32>
    %11 = arith.select %9, %0, %10 : vector<8x32xi1>, vector<8x32xf32>
    %cst_4 = arith.constant dense<0.000000e+00> : vector<8xf32>
    %12 = vector.multi_reduction <add>, %11, %cst_4 [1] : vector<8x32xf32> to vector<8xf32>
    %13 = vector.shape_cast %12 : vector<8xf32> to vector<8x1xf32>
    %c0_i32 = arith.constant 0 : i32
    %14 = arith.cmpi eq, %arg1, %c0_i32 : i32
    %15 = arith.extui %14 : i1 to i32
    %c0_i32_5 = arith.constant 0 : i32
    %16 = arith.cmpi ne, %15, %c0_i32_5 : i32
    scf.if %16 {
      %cst_16 = arith.constant 0.000000e+00 : f32
      %26 = vector.broadcast %cst_16 : f32 to vector<8x1xf32>
      %c0_17 = arith.constant 0 : index
      %c0_18 = arith.constant 0 : index
      %27 = vector.load %arg4[%c0_17, %c0_18] : memref<8x1xf32, #tpu.memory_space<vmem>>, vector<8x1xf32>
      tpu.vector_store %arg4[%c0_17, %c0_18], %26 {strides = array<i32>} : memref<8x1xf32, #tpu.memory_space<vmem>>, vector<8x1xf32>,
      %cst_19 = arith.constant 0.000000e+00 : f32
      %28 = vector.broadcast %cst_19 : f32 to vector<8x1xf32>
      %c0_20 = arith.constant 0 : index
      %c0_21 = arith.constant 0 : index
      %29 = vector.load %arg5[%c0_20, %c0_21] : memref<8x1xf32, #tpu.memory_space<vmem>>, vector<8x1xf32>
      tpu.vector_store %arg5[%c0_20, %c0_21], %28 {strides = array<i32>} : memref<8x1xf32, #tpu.memory_space<vmem>>, vector<8x1xf32>,
    } else {
    }
    %c0_6 = arith.constant 0 : index
    %c0_7 = arith.constant 0 : index
    %17 = vector.load %arg4[%c0_6, %c0_7] : memref<8x1xf32, #tpu.memory_space<vmem>>, vector<8x1xf32>
    %18 = arith.addf %17, %7 : vector<8x1xf32>
    %c0_8 = arith.constant 0 : index
    %c0_9 = arith.constant 0 : index
    %19 = vector.load %arg4[%c0_8, %c0_9] : memref<8x1xf32, #tpu.memory_space<vmem>>, vector<8x1xf32>
    tpu.vector_store %arg4[%c0_8, %c0_9], %18 {strides = array<i32>} : memref<8x1xf32, #tpu.memory_space<vmem>>, vector<8x1xf32>,
    %c0_10 = arith.constant 0 : index
    %c0_11 = arith.constant 0 : index
    %20 = vector.load %arg5[%c0_10, %c0_11] : memref<8x1xf32, #tpu.memory_space<vmem>>, vector<8x1xf32>
    %21 = arith.addf %20, %13 : vector<8x1xf32>
    %c0_12 = arith.constant 0 : index
    %c0_13 = arith.constant 0 : index
    %22 = vector.load %arg5[%c0_12, %c0_13] : memref<8x1xf32, #tpu.memory_space<vmem>>, vector<8x1xf32>
    tpu.vector_store %arg5[%c0_12, %c0_13], %21 {strides = array<i32>} : memref<8x1xf32, #tpu.memory_space<vmem>>, vector<8x1xf32>,
    %c0_i32_14 = arith.constant 0 : i32
    %23 = arith.cmpi eq, %arg1, %c0_i32_14 : i32
    %24 = arith.extui %23 : i1 to i32
    %c0_i32_15 = arith.constant 0 : i32
    %25 = arith.cmpi ne, %24, %c0_i32_15 : i32
    scf.if %25 {
      %c0_16 = arith.constant 0 : index
      %c0_17 = arith.constant 0 : index
      %26 = vector.load %arg2[%c0_16, %c0_17] : memref<8x1xi32, #tpu.memory_space<vmem>>, vector<8x1xi32>
      %c-100_i32 = arith.constant -100 : i32
      %27 = vector.broadcast %c-100_i32 : i32 to vector<8x1xi32>
      %28 = arith.cmpi ne, %26, %27 : vector<8x1xi32>
      %29 = arith.extui %28 : vector<8x1xi1> to vector<8x1xi32>
      %30 = arith.sitofp %29 : vector<8x1xi32> to vector<8x1xf32>
      %cst_18 = arith.constant 0.000000e+00 : f32
      %31 = vector.broadcast %cst_18 : f32 to vector<8x1xf32>
      %32 = arith.subf %31, %30 : vector<8x1xf32>
      %c0_19 = arith.constant 0 : index
      %c0_20 = arith.constant 0 : index
      %33 = vector.load %arg4[%c0_19, %c0_20] : memref<8x1xf32, #tpu.memory_space<vmem>>, vector<8x1xf32>
      %34 = arith.mulf %33, %32 : vector<8x1xf32>
      %c0_21 = arith.constant 0 : index
      %c0_22 = arith.constant 0 : index
      %35 = vector.load %arg4[%c0_21, %c0_22] : memref<8x1xf32, #tpu.memory_space<vmem>>, vector<8x1xf32>
      tpu.vector_store %arg4[%c0_21, %c0_22], %34 {strides = array<i32>} : memref<8x1xf32, #tpu.memory_space<vmem>>, vector<8x1xf32>,
      %c0_23 = arith.constant 0 : index
      %c0_24 = arith.constant 0 : index
      %36 = vector.load %arg5[%c0_23, %c0_24] : memref<8x1xf32, #tpu.memory_space<vmem>>, vector<8x1xf32>
      %37 = arith.mulf %36, %32 : vector<8x1xf32>
      %c0_25 = arith.constant 0 : index
      %c0_26 = arith.constant 0 : index
      %38 = vector.load %arg5[%c0_25, %c0_26] : memref<8x1xf32, #tpu.memory_space<vmem>>, vector<8x1xf32>
      tpu.vector_store %arg5[%c0_25, %c0_26], %37 {strides = array<i32>} : memref<8x1xf32, #tpu.memory_space<vmem>>, vector<8x1xf32>,
    } else {
    }
    return
  }
  func.func @transform_0(%arg0: i32, %arg1: i32) -> (i32, i32) {
    %c0_i32 = arith.constant 0 : i32
    %c0_i32_0 = arith.constant 0 : i32
    return %arg0, %c0_i32 : i32, i32
  }
  func.func @transform_1(%arg0: i32, %arg1: i32) -> (i32, i32) {
    %c0_i32 = arith.constant 0 : i32
    return %arg0, %arg1 : i32, i32
  }
  func.func @transform_2(%arg0: i32, %arg1: i32) -> (i32, i32) {
    %c0_i32 = arith.constant 0 : i32
    %c0_i32_0 = arith.constant 0 : i32
    return %arg0, %c0_i32 : i32, i32
  }
  func.func @transform_3(%arg0: i32, %arg1: i32) -> (i32, i32) {
    %c0_i32 = arith.constant 0 : i32
    %c0_i32_0 = arith.constant 0 : i32
    return %arg0, %c0_i32 : i32, i32
  }
}

</mosaic_0001>

<bundles_post_ra>
// kernel: tpu_custom_call.1
= control target key start
LH: loop header
LB: loop body
LE: loop exit
PB: predicated region body
PF: predicated region fallthrough
CT: control target
= control target key end

     0   :  { %v72_v0 = vmov 0   ;;  %vm36_vm0 = vcmask 7168   ;;  %v73_v2 = vmov 0.0   ;;  %vm20_vm1 = vcmask 261120   ;;  %s136_s0 = inlined_call_operand.vmem [shape: s32[8,1], index: 0, kind: input, shape index: {}]   ;;  %s137_s3 = inlined_call_operand.vmem [shape: f32[8,1], index: 3, kind: output, shape index: {1}]   ;;  %s138_s1 = inlined_call_operand.vmem [shape: f32[8,32], index: 1, kind: input, shape index: {}]   ;;  %s139_s2 = inlined_call_operand.vmem [shape: f32[8,1], index: 2, kind: output, shape index: {0}]  }
   0x1   :  { %71 = vset.pattern.permute.xlu0 %v72_v0  ;;  %v16_v1 = vld [vmem:[%s136_s0] sm:$0xff]  ;;  %38 = vst.msk [vmem:[%s137_s3] sm:$0xff] %vm36_vm0, %v73_v2  ;;  %v14_v5 = vlaneseq  ;;  %37 = vst.msk [vmem:[%s139_s2] sm:$0xff] %vm36_vm0, %v73_v2 }
   0x2   :  { %25 = vperm.xlu0 %71, %v16_v1   ;;  %v13_v3 = vld [vmem:[%s138_s1] sm:$0xff]  ;;  %vm50_vm3 = vcmp.ne.s32.totalorder %v16_v1, 4294967196 }
   0x3   :  { %v21_v4 = vsel %vm20_vm1, %v13_v3, 0.0  ;;  %v15_v6 = vand.u32 127, %v14_v5  ;;  %v68_v13 = vsel %vm50_vm3, 1.0, %v73_v2 }
   0x4   :  { %v53_v14 = vsub.f32 0.0, %v68_v13 }
   0x8   :  { %v39_v10 = vld [vmem:[%s139_s2] sm:$0xff] }
   0x9   :  { %v43_v17 = vld [vmem:[%s137_s3] sm:$0xff] }
  0x21   :  { %22 = vadd.xlane.f32.xlu0 %v21_v4 }
  0x81   :  { %v26_v7 = vpop.permute.xlu0 %25 }
  0x82   :  { %vm27_vm2 = vcmp.eq.s32.totalorder %v15_v6, %v26_v7 }
  0x83   :  { %v28_v8 = vsel %vm27_vm2, %v13_v3, 0.0 }
  0x84   :  { %v29_v9 = vsel %vm20_vm1, %v28_v8, 0.0 }
  0x85   :  { %30 = vadd.xlane.f32.xlu1 %v29_v9 }
  0xae   :  { %v23_v11 = vpop.xlane.xlu0 %22 }
  0xaf   :  { %v40_v12 = vadd.f32 %v39_v10, %v23_v11 }
  0xb1   :  { %42 = vst.msk [vmem:[%s139_s2] sm:$0xff] %vm36_vm0, %v40_v12 }
  0xb8   :  { %v54_v15 = vld [vmem:[%s139_s2] sm:$0xff] }
  0xb9   :  { %v55_v16 = vmul.f32 %v54_v15, %v53_v14 }
  0xbb   :  { %56 = vst.msk [vmem:[%s139_s2] sm:$0xff] %vm36_vm0, %v55_v16 }
 0x112   :  { %v31_v18 = vpop.xlane.xlu1 %30 }
 0x113   :  { %v44_v19 = vadd.f32 %v43_v17, %v31_v18 }
 0x115   :  { %45 = vst.msk [vmem:[%s137_s3] sm:$0xff] %vm36_vm0, %v44_v19 }
 0x11c   :  { %v57_v20 = vld [vmem:[%s137_s3] sm:$0xff] }
 0x11d   :  { %v58_v21 = vmul.f32 %v57_v20, %v53_v14 }
 0x11f   :  { %59 = vst.msk [vmem:[%s137_s3] sm:$0xff] %vm36_vm0, %v58_v21 }

</bundles_post_ra>
